<compile_context>
chip_gen: v6e
topology: v6e:2x2x1
jax: 0.10.0
libtpu: 0.0.40
codegen_flags: <defaults>
</compile_context>

<pallas_src>
from functools import lru_cache

import numpy as np
import jax
import jax.numpy as jnp
from jax.experimental import pallas as pl
from jax.experimental.pallas import tpu as pltpu

LARGENUMBER = 10000000.0


# ---------------------------------------------------------------------------
# Pallas kernel:
#   (or + i*oi)[r, c] = (sr + i*si)[r, c] * scale * exp(i*(py[r] + px[c]))
# with host-precomputed cx = cos(px), sx = sin(px) (lane axis, shape (1, N))
# and cy = scale*cos(py), sy = scale*sin(py) (sublane axis, shape (N, 1)).
# The 2-D cos/sin are rebuilt with the angle-sum identity: no transcendentals
# in-kernel, lane-dense stores, no extra temporaries.
# ---------------------------------------------------------------------------
def _tf_kernel(sr_ref, si_ref, cx_ref, sx_ref, cy_ref, sy_ref, or_ref, oi_ref):
    tr = sr_ref.shape[0]
    r0 = pl.program_id(0) * tr
    if tr % 8 == 0:
        r0 = pl.multiple_of(r0, 8)      # aligned sublane slice of resident col
    cy = cy_ref[pl.ds(r0, tr), :]       # (TR, 1), amplitude scale folded in
    sy = sy_ref[pl.ds(r0, tr), :]       # (TR, 1)
    cx = cx_ref[...]                    # (1, N)
    sx = sx_ref[...]                    # (1, N)
    # scale*cos(py + px), scale*sin(py + px) via the angle-sum identity.
    c = cy * cx - sy * sx               # (TR, N)
    s = sy * cx + cy * sx               # (TR, N)
    sr = sr_ref[...]
    si = si_ref[...]
    or_ref[...] = sr * c - si * s
    oi_ref[...] = sr * s + si * c


# ---------------------------------------------------------------------------
# VMEM budgeting / row-tile selection
# ---------------------------------------------------------------------------
def _vmem_budget_bytes():
    """(double-buffered working-set budget, scoped vmem_limit_bytes)."""
    cap = 64 << 20   # conservative default (v7x: 64 MiB VMEM per TensorCore)
    try:
        info_cap = getattr(pltpu.get_tpu_info(), "vmem_capacity_bytes", None)
        if isinstance(info_cap, (int, np.integer)) and int(info_cap) > 0:
            cap = int(info_cap)
    except Exception:
        pass
    budget = min(cap // 2, 40 << 20)                 # tile working set target
    limit = min((cap * 3) // 4, budget + (12 << 20))  # headroom for residents
    return int(budget), int(limit)


def _choose_row_tile(n_rows, n_cols, budget_bytes):
    # Per grid step: (2 in + 2 out) f32 (TR, N) planes, double-buffered.
    max_tr = max(8, budget_bytes // (32 * n_cols))
    if n_rows >= 32:
        # Keep >= 4 grid steps: DMA/compute overlap everywhere and lets the
        # "parallel" axis shard across v7x's two TensorCores.
        max_tr = min(max_tr, max(8, n_rows // 4))
    best = None
    for d in range(1, n_rows + 1):
        if n_rows % d == 0 and d <= max_tr and d % 8 == 0:
            best = d
    if best is not None:
        return best
    # No multiple-of-8 divisor fits the budget: fall back to the full array
    # (always a valid block shape).
    return n_rows


def _apply_tf(sr, si, cx, sx, cy, sy):
    """Row-tiled Pallas pass applying the (pre-scaled) Fresnel transfer fn."""
    n_rows, n_cols = sr.shape
    budget, vmem_limit = _vmem_budget_bytes()
    tr = _choose_row_tile(n_rows, n_cols, budget)
    tile = pl.BlockSpec((tr, n_cols), lambda i: (i, 0))
    row = pl.BlockSpec((1, n_cols), lambda i: (0, 0))      # resident lane vec
    col = pl.BlockSpec((n_rows, 1), lambda i: (0, 0))      # resident col vec
    return pl.pallas_call(
        _tf_kernel,
        out_shape=(jax.ShapeDtypeStruct((n_rows, n_cols), jnp.float32),
                   jax.ShapeDtypeStruct((n_rows, n_cols), jnp.float32)),
        grid=(n_rows // tr,),
        in_specs=[tile, tile, row, row, col, col],
        out_specs=(tile, tile),
        compiler_params=pltpu.CompilerParams(
            dimension_semantics=("parallel",),
            vmem_limit_bytes=vmem_limit),
    )(sr, si, cx, sx, cy, sy)


# ---------------------------------------------------------------------------
# jitted FFT -> Pallas transfer function -> IFFT path
# ---------------------------------------------------------------------------
@jax.jit
def _propagate_core(re, im, cx, sx, cy, sy):
    # TODO(synk): FFT/IFFT have no Pallas TPU primitive; they stay in XLA.
    # TODO(synk): operating directly on the interleaved complex64 spectrum
    # inside the kernel would need a complex64<->f32 bitcast, which
    # lax.bitcast_convert_type rejects; the real/imag split + complex
    # recombine therefore stay as XLA elementwise fusions (jit keeps them to
    # one read+write pass each).
    spec = jnp.fft.fft2(jax.lax.complex(re, im))
    sr = jnp.real(spec)
    si = jnp.imag(spec)
    or_, oi_ = _apply_tf(sr, si, cx, sx, cy, sy)
    out = jnp.fft.ifft2(jax.lax.complex(or_, oi_))
    return jnp.real(out), jnp.imag(out)


# ---------------------------------------------------------------------------
# Host-side separable phase trig vectors (float64, cached per geometry)
# ---------------------------------------------------------------------------
@lru_cache(maxsize=128)
def _phase_trig_vectors(z, size, wavelength, n):
    dx = size / n
    fx = np.fft.fftfreq(n, d=dx).astype(np.float64)
    fx2 = fx * fx
    coef = -np.pi * wavelength * z          # quadratic phase coefficient
    phase0 = 2.0 * np.pi / wavelength * z   # piston phase k*z
    px = coef * fx2                         # lane-axis phase
    py = phase0 + coef * fx2                # sublane-axis phase
    return np.cos(px), np.sin(px), np.cos(py), np.sin(py)


def fresnel_propagate_scaled(field, z, size, wavelength, scale):
    """scale * IFFT2( FFT2(F) * H ),  H = exp(i*(k*z - pi*lam*z*(fx^2+fy^2)))."""
    re, im = field
    n_rows, n_cols = re.shape
    # NOTE: the sublane-axis phase reuses the lane-axis frequencies; this is
    # only valid for square grids with equal sampling along both axes.
    assert n_rows == n_cols, "Fresnel propagator assumes a square N x N grid"
    cx, sx, cy, sy = _phase_trig_vectors(float(z), float(size),
                                         float(wavelength), int(n_cols))
    s = float(scale)   # folded into the column trig vectors (runtime data ->
                       # no retrace of the jitted path per (z, scale))
    cx_j = jnp.asarray(cx[None, :], dtype=jnp.float32)
    sx_j = jnp.asarray(sx[None, :], dtype=jnp.float32)
    cy_j = jnp.asarray((cy * s)[:, None], dtype=jnp.float32)
    sy_j = jnp.asarray((sy * s)[:, None], dtype=jnp.float32)
    return _propagate_core(jnp.asarray(re, dtype=jnp.float32),
                           jnp.asarray(im, dtype=jnp.float32),
                           cx_j, sx_j, cy_j, sy_j)


# ---------------------------------------------------------------------------
# Expander_Fresnel port (scalar bookkeeping mirrors the PyTorch module)
# ---------------------------------------------------------------------------
class ExpanderFresnelPallas:
    def __init__(self, wavelength):
        self.wavelength = float(wavelength)
        self.amp_scale = 0.0
        self.z1 = 0.0
        self.size = 0.0
        self.curvature = 0.0

    # --- Fresnel_VarSpherer_forward ---
    def _var_spherer_forward(self, field, f, z, gridsize, curvature):
        doub1 = curvature
        size = gridsize
        lam = self.wavelength
        if doub1 != 0.0:
            f1 = 1.0 / doub1
        else:
            f1 = LARGENUMBER * size ** 2 / lam
        if f + f1 != 0.0:
            f = f * f1 / (f + f1)
        else:
            f = LARGENUMBER * size ** 2 / lam
        if z - f == 0:
            z1 = LARGENUMBER
        else:
            z1 = -z * f / (z - f)
        ampl_scale = (f - z) / f
        # field = propagator(field, z1, size); field /= ampl_scale
        # The 1/ampl_scale is fused into the propagation's spectrum multiply
        # (IFFT is linear), saving a full elementwise HBM pass.
        field = fresnel_propagate_scaled(field, z1, size, lam, 1.0 / ampl_scale)
        size *= ampl_scale
        curvature = -1.0 / (z - f)
        return field, size, curvature, ampl_scale, z1

    # --- Fresnel_VarSpherer_inverse ---
    def _var_spherer_inverse(self, field, z1, size, curvature, ampl_scale):
        # field *= ampl_scale; field = propagator(field, z1, size/ampl_scale)
        # The ampl_scale multiply is fused into the propagation's spectrum
        # multiply (FFT is linear).
        size = size / ampl_scale
        curvature = 0
        field = fresnel_propagate_scaled(field, z1, size, self.wavelength,
                                         ampl_scale)
        return field, size, curvature

    def forward(self, Fin, f, z, gridsize, curvature):
        if z > 0:
            field, self.size, self.curvature, self.amp_scale, self.z1 = \
                self._var_spherer_forward(Fin, f, z, gridsize, curvature)
            return field, self.size, self.curvature
        else:
            return self._var_spherer_inverse(
                Fin, -self.z1, self.size, self.curvature, self.amp_scale)


# ---------------------------------------------------------------------------
# Pure-numpy (float64) reference of the same math
# ---------------------------------------------------------------------------
def _reference_forward(fin_re, fin_im, f, z, gridsize, curvature, wavelength):
    size = gridsize
    f1 = (1.0 / curvature) if curvature != 0.0 else LARGENUMBER * size ** 2 / wavelength
    f_eff = f * f1 / (f + f1) if (f + f1) != 0.0 else LARGENUMBER * size ** 2 / wavelength
    z1 = LARGENUMBER if (z - f_eff) == 0 else -z * f_eff / (z - f_eff)
    n = fin_re.shape[0]
    dx = size / n
    fx = np.fft.fftfreq(n, d=dx)
    fsq = fx[:, None] ** 2 + fx[None, :] ** 2
    k = 2.0 * np.pi / wavelength
    H = np.exp(1j * (k * z1 - np.pi * wavelength * z1 * fsq))
    spec = np.fft.fft2(fin_re.astype(np.float64) + 1j * fin_im.astype(np.float64))
    out = np.fft.ifft2(spec * H)
    ampl_scale = (f_eff - z) / f_eff
    out = out / ampl_scale
    return out, size * ampl_scale, -1.0 / (z - f_eff)


# ---------------------------------------------------------------------------
if __name__ == "__main__":
    N = 64
    wavelength = 1.064e-6          # m
    f = 0.2                        # lens focal length [m]
    z = 0.1                        # propagation distance [m] (> 0: forward branch)
    gridsize = 10e-3               # grid side length [m]
    curvature = 0.0

    key = jax.random.PRNGKey(0)
    kr, ki = jax.random.split(key)
    fin_re = jax.random.normal(kr, (N, N), dtype=jnp.float32)
    fin_im = jax.random.normal(ki, (N, N), dtype=jnp.float32)

    module = ExpanderFresnelPallas(wavelength)

    # forward branch (z > 0)
    (out_re, out_im), out_size, out_curv = module.forward(
        (fin_re, fin_im), f, z, gridsize, curvature)
    out_re = jax.block_until_ready(out_re)
    out_im = jax.block_until_ready(out_im)

    ref_out, ref_size, ref_curv = _reference_forward(
        np.asarray(fin_re), np.asarray(fin_im), f, z, gridsize, curvature, wavelength)

    assert np.allclose(np.asarray(out_re), np.real(ref_out), rtol=1e-3, atol=5e-3)
    assert np.allclose(np.asarray(out_im), np.imag(ref_out), rtol=1e-3, atol=5e-3)
    assert abs(out_size - float(ref_size)) < 1e-9
    assert abs(out_curv - float(ref_curv)) < 1e-9

    # inverse branch (z <= 0) should undo the forward step
    (rec_re, rec_im), rec_size, rec_curv = module.forward(
        (out_re, out_im), f, -1.0, gridsize, curvature)
    rec_re = jax.block_until_ready(rec_re)
    rec_im = jax.block_until_ready(rec_im)
    assert np.allclose(np.asarray(rec_re), np.asarray(fin_re), rtol=1e-3, atol=5e-3)
    assert np.allclose(np.asarray(rec_im), np.asarray(fin_im), rtol=1e-3, atol=5e-3)
    assert abs(rec_size - gridsize) < 1e-9
    assert rec_curv == 0

    print("KERNEL_OK")
</pallas_src>

<mosaic_0001>
module attributes {stable_mosaic.version = 11 : i64} {
  func.func @_tf_kernel(%arg0: i32, %arg1: memref<16x64xf32, #tpu.memory_space<vmem>>, %arg2: memref<16x64xf32, #tpu.memory_space<vmem>>, %arg3: memref<1x64xf32, #tpu.memory_space<vmem>>, %arg4: memref<1x64xf32, #tpu.memory_space<vmem>>, %arg5: memref<64x1xf32, #tpu.memory_space<vmem>>, %arg6: memref<64x1xf32, #tpu.memory_space<vmem>>, %arg7: memref<16x64xf32, #tpu.memory_space<vmem>>, %arg8: memref<16x64xf32, #tpu.memory_space<vmem>>) attributes {dimension_semantics = [#tpu.dimension_semantics<parallel>], iteration_bounds = array<i64: 4>, scalar_prefetch = 0 : i64, scratch_operands = 0 : i64, tpu.core_type = #tpu.core_type<tc>, window_params = [{transform_indices = @transform_0, window_bounds = array<i64: 16, 64>}, {transform_indices = @transform_1, window_bounds = array<i64: 16, 64>}, {pipeline_mode = #tpu.pipeline_mode<synchronous>, transform_indices = @transform_2, window_bounds = array<i64: 1, 64>}, {pipeline_mode = #tpu.pipeline_mode<synchronous>, transform_indices = @transform_3, window_bounds = array<i64: 1, 64>}, {pipeline_mode = #tpu.pipeline_mode<synchronous>, transform_indices = @transform_4, window_bounds = array<i64: 64, 1>}, {pipeline_mode = #tpu.pipeline_mode<synchronous>, transform_indices = @transform_5, window_bounds = array<i64: 64, 1>}, {transform_indices = @transform_6, window_bounds = array<i64: 16, 64>}, {transform_indices = @transform_7, window_bounds = array<i64: 16, 64>}]} {
    %c16_i32 = arith.constant 16 : i32
    %0 = arith.muli %arg0, %c16_i32 : i32
    %1 = tpu.assume_multiple %0, 8 : i32
    %2 = arith.index_cast %1 : i32 to index
    %c0 = arith.constant 0 : index
    %3 = vector.load %arg5[%2, %c0] : memref<64x1xf32, #tpu.memory_space<vmem>>, vector<16x1xf32>
    %4 = arith.index_cast %1 : i32 to index
    %c0_0 = arith.constant 0 : index
    %5 = vector.load %arg6[%4, %c0_0] : memref<64x1xf32, #tpu.memory_space<vmem>>, vector<16x1xf32>
    %c0_1 = arith.constant 0 : index
    %c0_2 = arith.constant 0 : index
    %6 = vector.load %arg3[%c0_1, %c0_2] : memref<1x64xf32, #tpu.memory_space<vmem>>, vector<1x64xf32>
    %c0_3 = arith.constant 0 : index
    %c0_4 = arith.constant 0 : index
    %7 = vector.load %arg4[%c0_3, %c0_4] : memref<1x64xf32, #tpu.memory_space<vmem>>, vector<1x64xf32>
    %8 = vector.broadcast %3 : vector<16x1xf32> to vector<16x64xf32>
    %9 = vector.broadcast %6 : vector<1x64xf32> to vector<16x64xf32>
    %10 = arith.mulf %8, %9 : vector<16x64xf32>
    %11 = vector.broadcast %5 : vector<16x1xf32> to vector<16x64xf32>
    %12 = vector.broadcast %7 : vector<1x64xf32> to vector<16x64xf32>
    %13 = arith.mulf %11, %12 : vector<16x64xf32>
    %14 = arith.subf %10, %13 : vector<16x64xf32>
    %15 = vector.broadcast %5 : vector<16x1xf32> to vector<16x64xf32>
    %16 = vector.broadcast %6 : vector<1x64xf32> to vector<16x64xf32>
    %17 = arith.mulf %15, %16 : vector<16x64xf32>
    %18 = vector.broadcast %3 : vector<16x1xf32> to vector<16x64xf32>
    %19 = vector.broadcast %7 : vector<1x64xf32> to vector<16x64xf32>
    %20 = arith.mulf %18, %19 : vector<16x64xf32>
    %21 = arith.addf %17, %20 : vector<16x64xf32>
    %c0_5 = arith.constant 0 : index
    %c0_6 = arith.constant 0 : index
    %22 = vector.load %arg1[%c0_5, %c0_6] : memref<16x64xf32, #tpu.memory_space<vmem>>, vector<16x64xf32>
    %c0_7 = arith.constant 0 : index
    %c0_8 = arith.constant 0 : index
    %23 = vector.load %arg2[%c0_7, %c0_8] : memref<16x64xf32, #tpu.memory_space<vmem>>, vector<16x64xf32>
    %24 = arith.mulf %22, %14 : vector<16x64xf32>
    %25 = arith.mulf %23, %21 : vector<16x64xf32>
    %26 = arith.subf %24, %25 : vector<16x64xf32>
    %c0_9 = arith.constant 0 : index
    %c0_10 = arith.constant 0 : index
    %27 = vector.load %arg7[%c0_9, %c0_10] : memref<16x64xf32, #tpu.memory_space<vmem>>, vector<16x64xf32>
    tpu.vector_store %arg7[%c0_9, %c0_10], %26 {strides = array<i32>} : memref<16x64xf32, #tpu.memory_space<vmem>>, vector<16x64xf32>,
    %28 = arith.mulf %22, %21 : vector<16x64xf32>
    %29 = arith.mulf %23, %14 : vector<16x64xf32>
    %30 = arith.addf %28, %29 : vector<16x64xf32>
    %c0_11 = arith.constant 0 : index
    %c0_12 = arith.constant 0 : index
    %31 = vector.load %arg8[%c0_11, %c0_12] : memref<16x64xf32, #tpu.memory_space<vmem>>, vector<16x64xf32>
    tpu.vector_store %arg8[%c0_11, %c0_12], %30 {strides = array<i32>} : memref<16x64xf32, #tpu.memory_space<vmem>>, vector<16x64xf32>,
    return
  }
  func.func @transform_0(%arg0: i32) -> (i32, i32) {
    %c0_i32 = arith.constant 0 : i32
    %c0_i32_0 = arith.constant 0 : i32
    return %arg0, %c0_i32 : i32, i32
  }
  func.func @transform_1(%arg0: i32) -> (i32, i32) {
    %c0_i32 = arith.constant 0 : i32
    %c0_i32_0 = arith.constant 0 : i32
    return %arg0, %c0_i32 : i32, i32
  }
  func.func @transform_2(%arg0: i32) -> (i32, i32) {
    %c0_i32 = arith.constant 0 : i32
    %c0_i32_0 = arith.constant 0 : i32
    %c0_i32_1 = arith.constant 0 : i32
    return %c0_i32, %c0_i32_0 : i32, i32
  }
  func.func @transform_3(%arg0: i32) -> (i32, i32) {
    %c0_i32 = arith.constant 0 : i32
    %c0_i32_0 = arith.constant 0 : i32
    %c0_i32_1 = arith.constant 0 : i32
    return %c0_i32, %c0_i32_0 : i32, i32
  }
  func.func @transform_4(%arg0: i32) -> (i32, i32) {
    %c0_i32 = arith.constant 0 : i32
    %c0_i32_0 = arith.constant 0 : i32
    %c0_i32_1 = arith.constant 0 : i32
    return %c0_i32, %c0_i32_0 : i32, i32
  }
  func.func @transform_5(%arg0: i32) -> (i32, i32) {
    %c0_i32 = arith.constant 0 : i32
    %c0_i32_0 = arith.constant 0 : i32
    %c0_i32_1 = arith.constant 0 : i32
    return %c0_i32, %c0_i32_0 : i32, i32
  }
  func.func @transform_6(%arg0: i32) -> (i32, i32) {
    %c0_i32 = arith.constant 0 : i32
    %c0_i32_0 = arith.constant 0 : i32
    return %arg0, %c0_i32 : i32, i32
  }
  func.func @transform_7(%arg0: i32) -> (i32, i32) {
    %c0_i32 = arith.constant 0 : i32
    %c0_i32_0 = arith.constant 0 : i32
    return %arg0, %c0_i32 : i32, i32
  }
}

</mosaic_0001>

<bundles_post_ra>
// kernel: _propagate_core.1
= control target key start
LH: loop header
LB: loop body
LE: loop exit
PB: predicated region body
PF: predicated region fallthrough
CT: control target
= control target key end

     0   :  { %s576_s24 = smov 0   ;;  %s617_s0 = inlined_call_operand.vmem [shape: f32[64,64], index: 0, kind: input, shape index: {}]   ;;  %s618_s1 = inlined_call_operand.vmem [shape: f32[64,64], index: 1, kind: input, shape index: {}]   ;;  %s619_s2 = inlined_call_operand.vmem [shape: f32[1,64], index: 2, kind: input, shape index: {}]   ;;  %s620_s3 = inlined_call_operand.vmem [shape: f32[1,64], index: 3, kind: input, shape index: {}]   ;;  %s621_s4 = inlined_call_operand.vmem [shape: f32[64,1], index: 4, kind: input, shape index: {}]   ;;  %s622_s5 = inlined_call_operand.vmem [shape: f32[64,1], index: 5, kind: input, shape index: {}]   ;;  %s623_s6 = inlined_call_operand.vmem [shape: f32[64,64], index: 6, kind: output, shape index: {0}]   ;;  %s624_s7 = inlined_call_operand.vmem [shape: f32[64,64], index: 7, kind: output, shape index: {1}]  }
   0x1 LB: > { %s498_s25 = sadd.s32 4294967295, %s533_s24   ;;  %p502_p0 = scmp.ge.s32.totalorder %s533_s24, 1  ;;  %s533_s24 = sphi %s576_s24, %s18_s24  }
   0x2   : > { %p252_p1 = scmp.lt.s32.totalorder %s533_s24, 5 }
   0x4   : > { %p253_p2 = pnand %p502_p0, %p252_p1 }
   0x5   : > { %s511_s26 = sshll.u32 (!%p253_p2), %s498_s25, 4  ;;  %s503_s10 = sshll.u32 (!%p253_p2), %s498_s25, 1 }
   0x6   : > { %256 = sbr.rel (%p253_p2) target bundleno = 151 (0x97), region = 44  ;;  %s319_s29 = scalar_lea.vmem (!%p253_p2), %s621_s4, %s511_s26 }
   0x7   : > { %s322_s9 = scalar_lea.vmem (!%p253_p2), %s622_s5, %s511_s26  ;;  %p295_p3 = scmp.lt.s32.totalorder (!%p253_p2), %s503_s10, 7 }
   0xb   : > { %v535_v0 = vmov 0   ;;  %v321_v1 = vld [vmem:[%s319_s29 + $0x8] sm:$0xff]  ;;  %v320_v2 = vld [vmem:[%s319_s29] sm:$0xff]  ;;  %s626_s10 = smov (!%p295_p3, %s503_s10), 7  ;;  %vm381_vm0 = vcmask 523264  }
   0xc   : > { %526 = vset.pattern.permute.xlu1 %v535_v0  ;;  %525 = vset.pattern.permute.xlu0 %v535_v0  ;;  %v324_v3 = vld [vmem:[%s322_s9 + $0x8] sm:$0xff]  ;;  %v323_v4 = vld [vmem:[%s322_s9] sm:$0xff]  ;;  %s590_s11 = sshll.u32 %s626_s10, 3 }
   0xd   : > { %334 = vperm.xlu1 %526, %v321_v1   ;;  %329 = vperm.xlu0 %525, %v320_v2   ;;  %v512_v7 = vld [vmem:[%s619_s2] ss:$0 sm:$0xff]  ;;  %s298_s18 = scalar_lea.vmem %s617_s0, %s590_s11  ;;  %s304_s21 = scalar_lea.vmem %s618_s1, %s590_s11 }
   0xe   : > { %v513_v8 = vld [vmem:[%s620_s3] ss:$0 sm:$0xff]  ;;  %v372_v19 = vld [vmem:[%s298_s18 + $0x8] sm:$0xff]  ;;  %s310_s25 = scalar_lea.vmem %s623_s6, %s590_s11  ;;  %s316_s28 = scalar_lea.vmem %s624_s7, %s590_s11 }
   0xf   : > { %v374_v20 = vld [vmem:[%s304_s21 + $0x8] sm:$0xff]  ;;  %v371_v25 = vld [vmem:[%s298_s18] sm:$0xff] }
  0x10   : > { %v373_v26 = vld [vmem:[%s304_s21] sm:$0xff] }
  0x11   : > { %352 = vperm.xlu1 %526, %v324_v3   ;;  %347 = vperm.xlu0 %525, %v323_v4  }
  0x88   : > { %v335_v5 = vpop.permute.xlu1 %334  ;;  %v330_v6 = vpop.permute.xlu0 %329 }
  0x89   : > { %v344_v9 = vmul.f32 %v512_v7, %v335_v5  ;;  %v368_v10 = vmul.f32 %v513_v8, %v335_v5  ;;  %v343_v11 = vmul.f32 %v512_v7, %v330_v6  ;;  %v367_v12 = vmul.f32 %v513_v8, %v330_v6 }
  0x8c   : > { %v353_v13 = vpop.permute.xlu1 %352  ;;  %v348_v14 = vpop.permute.xlu0 %347 }
  0x8d   : > { %v362_v15 = vmul.f32 %v513_v8, %v353_v13  ;;  %v366_v16 = vmul.f32 %v512_v7, %v353_v13  ;;  %v361_v17 = vmul.f32 %v513_v8, %v348_v14  ;;  %v365_v18 = vmul.f32 %v512_v7, %v348_v14 }
  0x8f   : > { %v364_v21 = vsub.f32 %v344_v9, %v362_v15  ;;  %v370_v22 = vadd.f32 %v368_v10, %v366_v16  ;;  %v363_v23 = vsub.f32 %v343_v11, %v361_v17  ;;  %v369_v24 = vadd.f32 %v367_v12, %v365_v18 }
  0x91   : > { %v376_v27 = vmul.f32 %v372_v19, %v364_v21  ;;  %v378_v28 = vmul.f32 %v374_v20, %v370_v22  ;;  %v385_v29 = vmul.f32 %v372_v19, %v370_v22  ;;  %v387_v30 = vmul.f32 %v374_v20, %v364_v21 }
  0x92   : > { %v375_v31 = vmul.f32 %v371_v25, %v363_v23  ;;  %v377_v32 = vmul.f32 %v373_v26, %v369_v24  ;;  %v384_v33 = vmul.f32 %v371_v25, %v369_v24  ;;  %v386_v34 = vmul.f32 %v373_v26, %v363_v23 }
  0x93   : > { %v380_v35 = vsub.f32 %v376_v27, %v378_v28  ;;  %v389_v36 = vadd.f32 %v387_v30, %v385_v29 }
  0x94   : > { %v379_v37 = vsub.f32 %v375_v31, %v377_v32  ;;  %v388_v38 = vadd.f32 %v386_v34, %v384_v33 }
  0x95   : > { %383 = vst.msk [vmem:[%s310_s25 + $0x8] sm:$0xff] %vm381_vm0, %v380_v35  ;;  %391 = vst.msk [vmem:[%s316_s28 + $0x8] sm:$0xff] %vm381_vm0, %v389_v36 }
  0x96   : > { %382 = vst.msk [vmem:[%s310_s25] sm:$0xff] %vm381_vm0, %v379_v37  ;;  %390 = vst.msk [vmem:[%s316_s28] sm:$0xff] %vm381_vm0, %v388_v38 }
  0x97 PF: > { %s18_s24 = sadd.s32 1, %s533_s24  }
  0x98   : > { %p15_p4 = scmp.ge.s32.totalorder %s18_s24, 6  }
  0x9a   :  { %17 = sbr.rel (!%p15_p4) target bundleno = 1 (0x1), region = 91 }

</bundles_post_ra>
